<compile_context>
chip_gen: v5e
topology: v5e:2x2
jax: 0.10.0
libtpu: 0.0.40
codegen_flags: <defaults>
</compile_context>

<pallas_src>
import jax
import jax.numpy as jnp
from jax import lax
from jax.experimental import pallas as pl
from jax.experimental.pallas import tpu as pltpu


def _round_up(x, m):
    return ((x + m - 1) // m) * m


def critic_res_kernel(x_ref, w0_ref, w12_ref, b_ref, w3t_ref, b3_ref, o_ref):
    wdt = w0_ref.dtype

    # linear0 + ReLU (torch.cat fused: x = [state || action], zero-padded to Kp lanes)
    h0 = jnp.dot(x_ref[...], w0_ref[...], preferred_element_type=jnp.float32)
    h0 = jnp.maximum(h0 + b_ref[0:1, :], 0.0)          # residual, kept in f32

    # linear1 + ReLU
    h1 = jnp.dot(h0.astype(wdt), w12_ref[0, :, :], preferred_element_type=jnp.float32)
    h1 = jnp.maximum(h1 + b_ref[1:2, :], 0.0)

    # linear2 + residual + ReLU
    h2 = jnp.dot(h1.astype(wdt), w12_ref[1, :, :], preferred_element_type=jnp.float32)
    h2 = jnp.maximum(h2 + b_ref[2:3, :] + h0, 0.0)

    # linear3: lane-dense (O, tm) head — w3 kept in torch's (out, in) layout,
    # contract on H against h2 (tm, H).  For O == 1 this is one M=1,N=tm MXU pass.
    out = lax.dot_general(
        w3t_ref[...], h2.astype(wdt),
        dimension_numbers=(((1,), (1,)), ((), ())),
        preferred_element_type=jnp.float32)
    o_ref[...] = (out + b3_ref[...]).astype(o_ref.dtype)


def _choose_tiles(batch, block_m):
    """Pick (tm, padded_batch)."""
    br = _round_up(batch, 16)          # bf16 packs 2 rows/sublane -> 16-row multiples
    if br <= 128:                      # tiny batch: single tile (block == full array)
        return br, br
    # >= 2 lane-aligned tiles: lane-dense (O, tm) output stores and both
    # TensorCores busy on v7x (batch axis marked "parallel").
    tm = max(128, min(_round_up(block_m, 128), _round_up(pl.cdiv(br, 2), 128)))
    return tm, _round_up(br, tm)


def _const_spec(shape, single_buffer):
    """BlockSpec for a grid-invariant (VMEM-resident) operand."""
    ndim = len(shape)
    index_map = lambda i, _n=ndim: (0,) * _n
    if single_buffer:
        # Fetched once; a single buffer halves its VMEM vs. default double-buffering.
        return pl.BlockSpec(shape, index_map, pipeline_mode=pl.Buffered(1))
    return pl.BlockSpec(shape, index_map)


def critic_res_forward(state, action, params, *, block_m=512):
    """Fused CriticRes forward (bn=False path).

    params (see init_params): w0 (Kp,Hp), w12 (2,Hp,Hp), w3t (O,Hp) in bf16,
    b012 (3,Hp) f32, b3 (O,1) f32 — feature dims already zero-padded to 128.
    """
    B, S = state.shape
    A = action.shape[1]
    w0, w12, b012, w3t, b3 = (params["w0"], params["w12"], params["b012"],
                              params["w3t"], params["b3"])
    Kp, Hp = w0.shape
    O = w3t.shape[0]

    tm, Bp = _choose_tiles(B, block_m)

    # Fused torch.cat + batch/K zero-padding, one bf16 LHS operand.
    x = jnp.concatenate([state, action], axis=1).astype(jnp.bfloat16)
    x = jnp.pad(x, ((0, Bp - B), (0, Kp - (S + A))))

    grid = (Bp // tm,)
    operands = (x, w0, w12, b012, w3t, b3)
    flops = 2 * Bp * (Kp * Hp + 2 * Hp * Hp + Hp * O)
    bytes_accessed = sum(int(v.size) * v.dtype.itemsize for v in operands) + Bp * O * 4

    # VMEM footprint: 2x input tile + 1x resident weights/biases
    # + ~4 f32 (tm,Hp) intermediates + 2x output tile; generous 2x headroom,
    # clamped to [32 MiB, 48 MiB] (above v5e's 16 MiB scoped default, below
    # v7x's 64 MiB physical per TensorCore).
    est_vmem = (2 * tm * Kp * 2
                + (Kp * Hp + 2 * Hp * Hp + O * Hp) * 2 + (3 * Hp + O) * 4
                + 4 * tm * Hp * 4
                + 2 * O * tm * 4)
    vmem_limit = int(min(48 << 20, max(32 << 20, 2 * est_vmem)))

    def build(single_buffer):
        return pl.pallas_call(
            critic_res_kernel,
            out_shape=jax.ShapeDtypeStruct((O, Bp), jnp.float32),
            grid=grid,
            in_specs=[
                pl.BlockSpec((tm, Kp), lambda i: (i, 0)),
                _const_spec(w0.shape, single_buffer),
                _const_spec(w12.shape, single_buffer),
                _const_spec(b012.shape, single_buffer),
                _const_spec(w3t.shape, single_buffer),
                _const_spec(b3.shape, single_buffer),
            ],
            # Lane-dense output: last dim of the block is tm (>=128 for real batches).
            out_specs=pl.BlockSpec((O, tm), lambda i: (0, i)),
            compiler_params=pltpu.CompilerParams(
                dimension_semantics=("parallel",),
                vmem_limit_bytes=vmem_limit),
            cost_estimate=pl.CostEstimate(
                flops=flops, transcendentals=0, bytes_accessed=bytes_accessed),
        )

    try:
        out = jax.block_until_ready(build(True)(*operands))
    except Exception:
        # pl.Buffered(1) not accepted on this jax/libtpu -> default double-buffering.
        out = jax.block_until_ready(build(False)(*operands))

    return out[:, :B].T   # (O, Bp) -> (B, O)


def init_params(key, state_size, action_size, hidden_size, output_size, *, lane=128):
    """nn.Linear-style init (uniform +/- 1/sqrt(fan_in)).

    Weights are stored pre-transposed to (in, out) — except w3t, which keeps
    torch's (out, in) layout so the kernel emits a lane-dense (O, batch) block —
    zero-padded to 128-lane multiples and cast to bf16 once; biases stay f32.
    w1/w2 are coalesced into one array, b0/b1/b2 into another (fewer DMAs).
    """
    in0 = state_size + action_size
    Kp = _round_up(in0, lane)
    Hp = _round_up(hidden_size, lane)

    def linear(k, fan_in, fan_out):
        kw, kb = jax.random.split(k)
        bound = 1.0 / (fan_in ** 0.5)
        w = jax.random.uniform(kw, (fan_in, fan_out), jnp.float32, -bound, bound)
        b = jax.random.uniform(kb, (fan_out,), jnp.float32, -bound, bound)
        return w, b

    k0, k1, k2, k3 = jax.random.split(key, 4)
    w0, b0 = linear(k0, in0, hidden_size)
    w1, b1 = linear(k1, hidden_size, hidden_size)
    w2, b2 = linear(k2, hidden_size, hidden_size)
    w3, b3 = linear(k3, hidden_size, output_size)

    def pad2(w, rows, cols):
        return jnp.pad(w, ((0, rows - w.shape[0]), (0, cols - w.shape[1])))

    return {
        "w0":   pad2(w0, Kp, Hp).astype(jnp.bfloat16),
        "w12":  jnp.stack([pad2(w1, Hp, Hp), pad2(w2, Hp, Hp)]).astype(jnp.bfloat16),
        "w3t":  pad2(w3.T, output_size, Hp).astype(jnp.bfloat16),
        "b012": jnp.stack([jnp.pad(b, (0, Hp - hidden_size)) for b in (b0, b1, b2)]),
        "b3":   b3.reshape(output_size, 1),
    }


def reference_forward(state, action, params):
    """Pure-JAX reference on the same bf16-rounded, zero-padded parameters."""
    f32 = jnp.float32
    Kp = params["w0"].shape[0]
    x = jnp.concatenate([state, action], axis=1).astype(jnp.bfloat16).astype(f32)
    x = jnp.pad(x, ((0, 0), (0, Kp - x.shape[1])))
    w0 = params["w0"].astype(f32)
    w1 = params["w12"][0].astype(f32)
    w2 = params["w12"][1].astype(f32)
    w3t = params["w3t"].astype(f32)
    b0, b1, b2 = params["b012"]

    def r(h):  # mimic the kernel's bf16 re-quantization of MXU inputs
        return h.astype(jnp.bfloat16).astype(f32)

    h0 = jnp.maximum(x @ w0 + b0, 0.0)
    h1 = jnp.maximum(r(h0) @ w1 + b1, 0.0)
    h2 = jnp.maximum(r(h1) @ w2 + b2 + h0, 0.0)
    return r(h2) @ w3t.T + params["b3"].T


if __name__ == "__main__":
    batch = 2
    state_size = 12
    action_size = 4
    hidden_size = 32
    output_size = 1

    key = jax.random.PRNGKey(0)
    key, ks, ka, kp = jax.random.split(key, 4)
    state = jax.random.normal(ks, (batch, state_size), jnp.float32)
    action = jax.random.normal(ka, (batch, action_size), jnp.float32)
    params = init_params(kp, state_size, action_size, hidden_size, output_size)

    out = jax.block_until_ready(critic_res_forward(state, action, params))
    ref = reference_forward(state, action, params)

    assert out.shape == (batch, output_size)
    assert jnp.allclose(out, ref, atol=3e-2, rtol=3e-2), (out, ref)
    print("KERNEL_OK")
</pallas_src>

<mosaic_0001>
module attributes {stable_mosaic.version = 11 : i64} {
  func.func @critic_res_kernel(%arg0: i32, %arg1: memref<16x128xbf16, #tpu.memory_space<vmem>>, %arg2: memref<128x128xbf16, #tpu.memory_space<vmem>>, %arg3: memref<2x128x128xbf16, #tpu.memory_space<vmem>>, %arg4: memref<3x128xf32, #tpu.memory_space<vmem>>, %arg5: memref<1x128xbf16, #tpu.memory_space<vmem>>, %arg6: memref<1x1xf32, #tpu.memory_space<vmem>>, %arg7: memref<1x16xf32, #tpu.memory_space<vmem>>) attributes {dimension_semantics = [#tpu.dimension_semantics<parallel>], iteration_bounds = array<i64: 1>, scalar_prefetch = 0 : i64, scratch_operands = 0 : i64, tpu.core_type = #tpu.core_type<tc>, window_params = [{transform_indices = @transform_0, window_bounds = array<i64: 16, 128>}, {pipeline_mode = #tpu.pipeline_mode<synchronous>, transform_indices = @transform_1, window_bounds = array<i64: 128, 128>}, {pipeline_mode = #tpu.pipeline_mode<synchronous>, transform_indices = @transform_2, window_bounds = array<i64: 2, 128, 128>}, {pipeline_mode = #tpu.pipeline_mode<synchronous>, transform_indices = @transform_3, window_bounds = array<i64: 3, 128>}, {pipeline_mode = #tpu.pipeline_mode<synchronous>, transform_indices = @transform_4, window_bounds = array<i64: 1, 128>}, {pipeline_mode = #tpu.pipeline_mode<synchronous>, transform_indices = @transform_5, window_bounds = array<i64: 1, 1>}, {transform_indices = @transform_6, window_bounds = array<i64: 1, 16>}]} {
    %c0 = arith.constant 0 : index
    %c0_0 = arith.constant 0 : index
    %0 = vector.load %arg1[%c0, %c0_0] : memref<16x128xbf16, #tpu.memory_space<vmem>>, vector<16x128xbf16>
    %c0_1 = arith.constant 0 : index
    %c0_2 = arith.constant 0 : index
    %1 = vector.load %arg2[%c0_1, %c0_2] : memref<128x128xbf16, #tpu.memory_space<vmem>>, vector<128x128xbf16>
    %cst = arith.constant dense<0.000000e+00> : vector<16x128xf32>
    %2 = tpu.matmul %0, %1, %cst {dimension_numbers = #tpu.dot_dimension_numbers<[1], [0], [0], [1], [0, 0, 1, 1], [], []>} : vector<16x128xbf16>, vector<128x128xbf16>, vector<16x128xf32> -> vector<16x128xf32>
    %c0_3 = arith.constant 0 : index
    %c0_4 = arith.constant 0 : index
    %3 = vector.load %arg4[%c0_3, %c0_4] : memref<3x128xf32, #tpu.memory_space<vmem>>, vector<1x128xf32>
    %4 = vector.broadcast %3 : vector<1x128xf32> to vector<16x128xf32>
    %5 = arith.addf %2, %4 : vector<16x128xf32>
    %cst_5 = arith.constant 0.000000e+00 : f32
    %6 = vector.broadcast %cst_5 : f32 to vector<16x128xf32>
    %7 = arith.maximumf %5, %6 : vector<16x128xf32>
    %8 = arith.truncf %7 : vector<16x128xf32> to vector<16x128xbf16>
    %c0_6 = arith.constant 0 : index
    %c0_7 = arith.constant 0 : index
    %c0_8 = arith.constant 0 : index
    %9 = vector.load %arg3[%c0_6, %c0_7, %c0_8] : memref<2x128x128xbf16, #tpu.memory_space<vmem>>, vector<1x128x128xbf16>
    %10 = vector.shape_cast %9 : vector<1x128x128xbf16> to vector<128x128xbf16>
    %cst_9 = arith.constant dense<0.000000e+00> : vector<16x128xf32>
    %11 = tpu.matmul %8, %10, %cst_9 {dimension_numbers = #tpu.dot_dimension_numbers<[1], [0], [0], [1], [0, 0, 1, 1], [], []>} : vector<16x128xbf16>, vector<128x128xbf16>, vector<16x128xf32> -> vector<16x128xf32>
    %c1 = arith.constant 1 : index
    %c0_10 = arith.constant 0 : index
    %12 = vector.load %arg4[%c1, %c0_10] : memref<3x128xf32, #tpu.memory_space<vmem>>, vector<1x128xf32>
    %13 = vector.broadcast %12 : vector<1x128xf32> to vector<16x128xf32>
    %14 = arith.addf %11, %13 : vector<16x128xf32>
    %cst_11 = arith.constant 0.000000e+00 : f32
    %15 = vector.broadcast %cst_11 : f32 to vector<16x128xf32>
    %16 = arith.maximumf %14, %15 : vector<16x128xf32>
    %17 = arith.truncf %16 : vector<16x128xf32> to vector<16x128xbf16>
    %c1_12 = arith.constant 1 : index
    %c0_13 = arith.constant 0 : index
    %c0_14 = arith.constant 0 : index
    %18 = vector.load %arg3[%c1_12, %c0_13, %c0_14] : memref<2x128x128xbf16, #tpu.memory_space<vmem>>, vector<1x128x128xbf16>
    %19 = vector.shape_cast %18 : vector<1x128x128xbf16> to vector<128x128xbf16>
    %cst_15 = arith.constant dense<0.000000e+00> : vector<16x128xf32>
    %20 = tpu.matmul %17, %19, %cst_15 {dimension_numbers = #tpu.dot_dimension_numbers<[1], [0], [0], [1], [0, 0, 1, 1], [], []>} : vector<16x128xbf16>, vector<128x128xbf16>, vector<16x128xf32> -> vector<16x128xf32>
    %c2 = arith.constant 2 : index
    %c0_16 = arith.constant 0 : index
    %21 = vector.load %arg4[%c2, %c0_16] : memref<3x128xf32, #tpu.memory_space<vmem>>, vector<1x128xf32>
    %22 = vector.broadcast %21 : vector<1x128xf32> to vector<16x128xf32>
    %23 = arith.addf %20, %22 : vector<16x128xf32>
    %24 = arith.addf %23, %7 : vector<16x128xf32>
    %cst_17 = arith.constant 0.000000e+00 : f32
    %25 = vector.broadcast %cst_17 : f32 to vector<16x128xf32>
    %26 = arith.maximumf %24, %25 : vector<16x128xf32>
    %c0_18 = arith.constant 0 : index
    %c0_19 = arith.constant 0 : index
    %27 = vector.load %arg5[%c0_18, %c0_19] : memref<1x128xbf16, #tpu.memory_space<vmem>>, vector<1x128xbf16>
    %28 = arith.truncf %26 : vector<16x128xf32> to vector<16x128xbf16>
    %cst_20 = arith.constant dense<0.000000e+00> : vector<1x16xf32>
    %29 = tpu.matmul %27, %28, %cst_20 {dimension_numbers = #tpu.dot_dimension_numbers<[1], [1], [0], [0], [0, 0, 1, 0], [], []>} : vector<1x128xbf16>, vector<16x128xbf16>, vector<1x16xf32> -> vector<1x16xf32>
    %c0_21 = arith.constant 0 : index
    %c0_22 = arith.constant 0 : index
    %30 = vector.load %arg6[%c0_21, %c0_22] : memref<1x1xf32, #tpu.memory_space<vmem>>, vector<1x1xf32>
    %31 = vector.broadcast %30 : vector<1x1xf32> to vector<1x16xf32>
    %32 = arith.addf %29, %31 : vector<1x16xf32>
    %c0_23 = arith.constant 0 : index
    %c0_24 = arith.constant 0 : index
    %33 = vector.load %arg7[%c0_23, %c0_24] : memref<1x16xf32, #tpu.memory_space<vmem>>, vector<1x16xf32>
    tpu.vector_store %arg7[%c0_23, %c0_24], %32 {strides = array<i32>} : memref<1x16xf32, #tpu.memory_space<vmem>>, vector<1x16xf32>,
    return
  }
  func.func @transform_0(%arg0: i32) -> (i32, i32) {
    %c0_i32 = arith.constant 0 : i32
    %c0_i32_0 = arith.constant 0 : i32
    return %arg0, %c0_i32 : i32, i32
  }
  func.func @transform_1(%arg0: i32) -> (i32, i32) {
    %c0_i32 = arith.constant 0 : i32
    %c0_i32_0 = arith.constant 0 : i32
    %c0_i32_1 = arith.constant 0 : i32
    return %c0_i32, %c0_i32_0 : i32, i32
  }
  func.func @transform_2(%arg0: i32) -> (i32, i32, i32) {
    %c0_i32 = arith.constant 0 : i32
    %c0_i32_0 = arith.constant 0 : i32
    %c0_i32_1 = arith.constant 0 : i32
    %c0_i32_2 = arith.constant 0 : i32
    return %c0_i32, %c0_i32_0, %c0_i32_1 : i32, i32, i32
  }
  func.func @transform_3(%arg0: i32) -> (i32, i32) {
    %c0_i32 = arith.constant 0 : i32
    %c0_i32_0 = arith.constant 0 : i32
    %c0_i32_1 = arith.constant 0 : i32
    return %c0_i32, %c0_i32_0 : i32, i32
  }
  func.func @transform_4(%arg0: i32) -> (i32, i32) {
    %c0_i32 = arith.constant 0 : i32
    %c0_i32_0 = arith.constant 0 : i32
    %c0_i32_1 = arith.constant 0 : i32
    return %c0_i32, %c0_i32_0 : i32, i32
  }
  func.func @transform_5(%arg0: i32) -> (i32, i32) {
    %c0_i32 = arith.constant 0 : i32
    %c0_i32_0 = arith.constant 0 : i32
    %c0_i32_1 = arith.constant 0 : i32
    return %c0_i32, %c0_i32_0 : i32, i32
  }
  func.func @transform_6(%arg0: i32) -> (i32, i32) {
    %c0_i32 = arith.constant 0 : i32
    %c0_i32_0 = arith.constant 0 : i32
    return %c0_i32, %arg0 : i32, i32
  }
}

module attributes {stable_mosaic.version = 11 : i64} {
  func.func @critic_res_kernel(%arg0: i32, %arg1: memref<16x128xbf16, #tpu.memory_space<vmem>>, %arg2: memref<128x128xbf16, #tpu.memory_space<vmem>>, %arg3: memref<2x128x128xbf16, #tpu.memory_space<vmem>>, %arg4: memref<3x128xf32, #tpu.memory_space<vmem>>, %arg5: memref<1x128xbf16, #tpu.memory_space<vmem>>, %arg6: memref<1x1xf32, #tpu.memory_space<vmem>>, %arg7: memref<1x16xf32, #tpu.memory_space<vmem>>) attributes {dimension_semantics = [#tpu.dimension_semantics<parallel>], iteration_bounds = array<i64: 1>, scalar_prefetch = 0 : i64, scratch_operands = 0 : i64, tpu.core_type = #tpu.core_type<tc>, window_params = [{transform_indices = @transform_0, window_bounds = array<i64: 16, 128>}, {pipeline_mode = #tpu.pipeline_mode<synchronous>, transform_indices = @transform_1, window_bounds = array<i64: 128, 128>}, {pipeline_mode = #tpu.pipeline_mode<synchronous>, transform_indices = @transform_2, window_bounds = array<i64: 2, 128, 128>}, {pipeline_mode = #tpu.pipeline_mode<synchronous>, transform_indices = @transform_3, window_bounds = array<i64: 3, 128>}, {pipeline_mode = #tpu.pipeline_mode<synchronous>, transform_indices = @transform_4, window_bounds = array<i64: 1, 128>}, {pipeline_mode = #tpu.pipeline_mode<synchronous>, transform_indices = @transform_5, window_bounds = array<i64: 1, 1>}, {transform_indices = @transform_6, window_bounds = array<i64: 1, 16>}]} {
    %c0 = arith.constant 0 : index
    %c0_0 = arith.constant 0 : index
    %0 = vector.load %arg1[%c0, %c0_0] : memref<16x128xbf16, #tpu.memory_space<vmem>>, vector<16x128xbf16>
    %c0_1 = arith.constant 0 : index
    %c0_2 = arith.constant 0 : index
    %1 = vector.load %arg2[%c0_1, %c0_2] : memref<128x128xbf16, #tpu.memory_space<vmem>>, vector<128x128xbf16>
    %cst = arith.constant dense<0.000000e+00> : vector<16x128xf32>
    %2 = tpu.matmul %0, %1, %cst {dimension_numbers = #tpu.dot_dimension_numbers<[1], [0], [0], [1], [0, 0, 1, 1], [], []>} : vector<16x128xbf16>, vector<128x128xbf16>, vector<16x128xf32> -> vector<16x128xf32>
    %c0_3 = arith.constant 0 : index
    %c0_4 = arith.constant 0 : index
    %3 = vector.load %arg4[%c0_3, %c0_4] : memref<3x128xf32, #tpu.memory_space<vmem>>, vector<1x128xf32>
    %4 = vector.broadcast %3 : vector<1x128xf32> to vector<16x128xf32>
    %5 = arith.addf %2, %4 : vector<16x128xf32>
    %cst_5 = arith.constant 0.000000e+00 : f32
    %6 = vector.broadcast %cst_5 : f32 to vector<16x128xf32>
    %7 = arith.maximumf %5, %6 : vector<16x128xf32>
    %8 = arith.truncf %7 : vector<16x128xf32> to vector<16x128xbf16>
    %c0_6 = arith.constant 0 : index
    %c0_7 = arith.constant 0 : index
    %c0_8 = arith.constant 0 : index
    %9 = vector.load %arg3[%c0_6, %c0_7, %c0_8] : memref<2x128x128xbf16, #tpu.memory_space<vmem>>, vector<1x128x128xbf16>
    %10 = vector.shape_cast %9 : vector<1x128x128xbf16> to vector<128x128xbf16>
    %cst_9 = arith.constant dense<0.000000e+00> : vector<16x128xf32>
    %11 = tpu.matmul %8, %10, %cst_9 {dimension_numbers = #tpu.dot_dimension_numbers<[1], [0], [0], [1], [0, 0, 1, 1], [], []>} : vector<16x128xbf16>, vector<128x128xbf16>, vector<16x128xf32> -> vector<16x128xf32>
    %c1 = arith.constant 1 : index
    %c0_10 = arith.constant 0 : index
    %12 = vector.load %arg4[%c1, %c0_10] : memref<3x128xf32, #tpu.memory_space<vmem>>, vector<1x128xf32>
    %13 = vector.broadcast %12 : vector<1x128xf32> to vector<16x128xf32>
    %14 = arith.addf %11, %13 : vector<16x128xf32>
    %cst_11 = arith.constant 0.000000e+00 : f32
    %15 = vector.broadcast %cst_11 : f32 to vector<16x128xf32>
    %16 = arith.maximumf %14, %15 : vector<16x128xf32>
    %17 = arith.truncf %16 : vector<16x128xf32> to vector<16x128xbf16>
    %c1_12 = arith.constant 1 : index
    %c0_13 = arith.constant 0 : index
    %c0_14 = arith.constant 0 : index
    %18 = vector.load %arg3[%c1_12, %c0_13, %c0_14] : memref<2x128x128xbf16, #tpu.memory_space<vmem>>, vector<1x128x128xbf16>
    %19 = vector.shape_cast %18 : vector<1x128x128xbf16> to vector<128x128xbf16>
    %cst_15 = arith.constant dense<0.000000e+00> : vector<16x128xf32>
    %20 = tpu.matmul %17, %19, %cst_15 {dimension_numbers = #tpu.dot_dimension_numbers<[1], [0], [0], [1], [0, 0, 1, 1], [], []>} : vector<16x128xbf16>, vector<128x128xbf16>, vector<16x128xf32> -> vector<16x128xf32>
    %c2 = arith.constant 2 : index
    %c0_16 = arith.constant 0 : index
    %21 = vector.load %arg4[%c2, %c0_16] : memref<3x128xf32, #tpu.memory_space<vmem>>, vector<1x128xf32>
    %22 = vector.broadcast %21 : vector<1x128xf32> to vector<16x128xf32>
    %23 = arith.addf %20, %22 : vector<16x128xf32>
    %24 = arith.addf %23, %7 : vector<16x128xf32>
    %cst_17 = arith.constant 0.000000e+00 : f32
    %25 = vector.broadcast %cst_17 : f32 to vector<16x128xf32>
    %26 = arith.maximumf %24, %25 : vector<16x128xf32>
    %c0_18 = arith.constant 0 : index
    %c0_19 = arith.constant 0 : index
    %27 = vector.load %arg5[%c0_18, %c0_19] : memref<1x128xbf16, #tpu.memory_space<vmem>>, vector<1x128xbf16>
    %28 = arith.truncf %26 : vector<16x128xf32> to vector<16x128xbf16>
    %cst_20 = arith.constant dense<0.000000e+00> : vector<1x16xf32>
    %29 = tpu.matmul %27, %28, %cst_20 {dimension_numbers = #tpu.dot_dimension_numbers<[1], [1], [0], [0], [0, 0, 1, 0], [], []>} : vector<1x128xbf16>, vector<16x128xbf16>, vector<1x16xf32> -> vector<1x16xf32>
    %c0_21 = arith.constant 0 : index
    %c0_22 = arith.constant 0 : index
    %30 = vector.load %arg6[%c0_21, %c0_22] : memref<1x1xf32, #tpu.memory_space<vmem>>, vector<1x1xf32>
    %31 = vector.broadcast %30 : vector<1x1xf32> to vector<1x16xf32>
    %32 = arith.addf %29, %31 : vector<1x16xf32>
    %c0_23 = arith.constant 0 : index
    %c0_24 = arith.constant 0 : index
    %33 = vector.load %arg7[%c0_23, %c0_24] : memref<1x16xf32, #tpu.memory_space<vmem>>, vector<1x16xf32>
    tpu.vector_store %arg7[%c0_23, %c0_24], %32 {strides = array<i32>} : memref<1x16xf32, #tpu.memory_space<vmem>>, vector<1x16xf32>,
    return
  }
  func.func @transform_0(%arg0: i32) -> (i32, i32) {
    %c0_i32 = arith.constant 0 : i32
    %c0_i32_0 = arith.constant 0 : i32
    return %arg0, %c0_i32 : i32, i32
  }
  func.func @transform_1(%arg0: i32) -> (i32, i32) {
    %c0_i32 = arith.constant 0 : i32
    %c0_i32_0 = arith.constant 0 : i32
    %c0_i32_1 = arith.constant 0 : i32
    return %c0_i32, %c0_i32_0 : i32, i32
  }
  func.func @transform_2(%arg0: i32) -> (i32, i32, i32) {
    %c0_i32 = arith.constant 0 : i32
    %c0_i32_0 = arith.constant 0 : i32
    %c0_i32_1 = arith.constant 0 : i32
    %c0_i32_2 = arith.constant 0 : i32
    return %c0_i32, %c0_i32_0, %c0_i32_1 : i32, i32, i32
  }
  func.func @transform_3(%arg0: i32) -> (i32, i32) {
    %c0_i32 = arith.constant 0 : i32
    %c0_i32_0 = arith.constant 0 : i32
    %c0_i32_1 = arith.constant 0 : i32
    return %c0_i32, %c0_i32_0 : i32, i32
  }
  func.func @transform_4(%arg0: i32) -> (i32, i32) {
    %c0_i32 = arith.constant 0 : i32
    %c0_i32_0 = arith.constant 0 : i32
    %c0_i32_1 = arith.constant 0 : i32
    return %c0_i32, %c0_i32_0 : i32, i32
  }
  func.func @transform_5(%arg0: i32) -> (i32, i32) {
    %c0_i32 = arith.constant 0 : i32
    %c0_i32_0 = arith.constant 0 : i32
    %c0_i32_1 = arith.constant 0 : i32
    return %c0_i32, %c0_i32_0 : i32, i32
  }
  func.func @transform_6(%arg0: i32) -> (i32, i32) {
    %c0_i32 = arith.constant 0 : i32
    %c0_i32_0 = arith.constant 0 : i32
    return %c0_i32, %arg0 : i32, i32
  }
}

</mosaic_0001>

<bundles_post_ra>
// kernel: tpu_custom_call.1
= control target key start
LH: loop header
LB: loop body
LE: loop exit
PB: predicated region body
PF: predicated region fallthrough
CT: control target
= control target key end

     0   :  { %s682_s0 = inlined_call_operand.hbm [shape: bf16[16,128], index: 0, kind: input, shape index: {}]   ;;  %s683_s1 = inlined_call_operand.hbm [shape: bf16[128,128], index: 1, kind: input, shape index: {}]   ;;  %s684_s2 = inlined_call_operand.hbm [shape: bf16[2,128,128], index: 2, kind: input, shape index: {}]   ;;  %s685_s3 = inlined_call_operand.vmem [shape: f32[3,128], index: 3, kind: input, shape index: {}]   ;;  %s686_s4 = inlined_call_operand.vmem [shape: bf16[1,128], index: 4, kind: input, shape index: {}]   ;;  %s687_s5 = inlined_call_operand.<no memory space> [shape: f32[1,1], index: 5, kind: input, shape index: {}]   ;;  %s688_s6 = inlined_call_operand.hbm [shape: f32[1,16], index: 6, kind: output, shape index: {}]  }
   0x1   :  { %v11_v0 = vstv %s687_s5 }
   0x2   :  { %12 = vst [vmem:[#allocation2] sm:$0x1] %v11_v0 }
   0x3   :  { %13 = vsyncpa [#allocation4], 0 }
   0x4   :  { %14 = vsyncpa [#allocation7], 0 }
   0x5   :  { %15 = vsyncpa [#allocation5], 0  ;;  %s33_s25 = sshll.u32 %s683_s1, 4  ;;  %s613_s26 = smov [#allocation6]   ;;  %s34_s25 = int_to_ptr.hbm [resolvable:$true] %s33_s25 }
   0x6   :  { %s35_s27 = sshll.u32 %s613_s26, 4  ;;  %s20_s30 = sshll.u32 %s682_s0, 4  ;;  %s36_s27 = int_to_ptr.vmem [resolvable:$true] %s35_s27  ;;  %s21_s30 = int_to_ptr.hbm [resolvable:$true] %s20_s30 }
   0x7   :  { %s614_s7 = smov 64   ;;  %s615_s8 = smov 4  }
   0x8   :  { %41 = dma.hbm_to_vmem [thread:$0]  %s34_s25, 1024, %s36_s27, [#allocation7], %s614_s7, %s614_s7, %s615_s8  }
   0x9   :  { %s616_s5 = smov [#allocation3]   ;;  %s46_s12 = sshll.u32 %s684_s2, 4  ;;  %s47_s12 = int_to_ptr.hbm [resolvable:$true] %s46_s12 }
   0xa   :  { %s22_s9 = sshll.u32 %s616_s5, 4  ;;  %s617_s1 = smov [#allocation8]   ;;  %s23_s9 = int_to_ptr.vmem [resolvable:$true] %s22_s9 }
   0xb   :  { %28 = dma.hbm_to_vmem [thread:$0]  %s21_s30, 128, %s23_s9, [#allocation4], %s614_s7, %s614_s7, %s615_s8  }
   0xc   :  { %s48_s13 = sshll.u32 %s617_s1, 4  ;;  %s49_s13 = int_to_ptr.vmem [resolvable:$true] %s48_s13 }
   0xd   :  { %54 = dma.hbm_to_vmem [thread:$0]  %s47_s12, 2048, %s49_s13, [#allocation7], %s614_s7, %s614_s7, %s615_s8  }
   0xe   :  { %607 = dma.done.wait [#allocation4], 128  }
   0xf   :  { %608 = vsyncadd [#allocation4], 4294967168 }
  0x10   :  { %609 = dma.done.wait [#allocation7], 3072  }
  0x11   :  { %610 = vsyncadd [#allocation7], 4294964224  ;;  %v483_v1 = vld [vmem:[#allocation6 + $0x38] sm:$0xff]  ;;  %v482_v2 = vld [vmem:[#allocation6 + $0x30] sm:$0xff]  ;;  %v618_v43 = vmov 0   ;;  %s619_s20 = smov [#allocation9]  }
  0x12   :  { %148 = vmatpush.bf16.msra.mxu0 %v483_v1  ;;  %v491_v3 = vld [vmem:[#allocation8 + $0x38] sm:$0xff]  ;;  %v490_v4 = vld [vmem:[#allocation8 + $0x30] sm:$0xff]  ;;  %v481_v5 = vld [vmem:[#allocation6 + $0x28] sm:$0xff]  ;;  %507 = vset.pattern.permute.xlu0 %v618_v43  ;;  %s362_s21 = sshll.u32 %s619_s20, 4  ;;  %s364_s23 = sshll.u32 %s688_s6, 4  ;;  %vm355_vm0 = vcmask 122880   ;;  %s363_s21 = int_to_ptr.vmem [resolvable:$true] %s362_s21  ;;  %s365_s23 = int_to_ptr.hbm [resolvable:$true] %s364_s23 }
  0x13   :  { %231 = vmatpush.bf16.msra.mxu1 %v491_v3  ;;  %v489_v6 = vld [vmem:[#allocation8 + $0x28] sm:$0xff]  ;;  %v480_v7 = vld [vmem:[#allocation6 + $0x20] sm:$0xff]  ;;  %v479_v9 = vld [vmem:[#allocation6 + $0x18] sm:$0xff] }
  0x14   :  { %v488_v8 = vld [vmem:[#allocation8 + $0x20] sm:$0xff]  ;;  %v478_v10 = vld [vmem:[#allocation6 + $0x10] sm:$0xff]  ;;  %v477_v11 = vld [vmem:[#allocation6 + $0x8] sm:$0xff] }
  0x15   :  { %v476_v12 = vld [vmem:[#allocation6] sm:$0xff]  ;;  %v475_v13 = vld [vmem:[#allocation3] sm:$0xff]  ;;  %v486_v15 = vld [vmem:[#allocation8 + $0x10] sm:$0xff] }
  0x16   :  { %149 = vmatpush.bf16.msra.mxu0 %v482_v2  ;;  %v487_v14 = vld [vmem:[#allocation8 + $0x18] sm:$0xff]  ;;  %v485_v16 = vld [vmem:[#allocation8 + $0x8] sm:$0xff]  ;;  %v484_v17 = vld [vmem:[#allocation8] sm:$0xff] }
  0x17   :  { %232 = vmatpush.bf16.msra.mxu1 %v490_v4  ;;  %v499_v18 = vld [vmem:[#allocation8 + $0x78] sm:$0xff]  ;;  %v498_v19 = vld [vmem:[#allocation8 + $0x70] sm:$0xff]  ;;  %v497_v20 = vld [vmem:[#allocation8 + $0x68] sm:$0xff] }
  0x18   :  { %315 = vmatpush.bf16.msra.mxu2 %v499_v18  ;;  %v496_v21 = vld [vmem:[#allocation8 + $0x60] sm:$0xff]  ;;  %v508_v23 = vld [vmem:[%s685_s3] ss:$0 sm:$0xff]  ;;  %v495_v30 = vld [vmem:[#allocation8 + $0x58] sm:$0xff] }
  0x19   :  { %v494_v31 = vld [vmem:[#allocation8 + $0x50] sm:$0xff]  ;;  %v493_v32 = vld [vmem:[#allocation8 + $0x48] sm:$0xff]  ;;  %v492_v33 = vld [vmem:[#allocation8 + $0x40] sm:$0xff] }
  0x1a   :  { %150 = vmatpush.bf16.msra.mxu0 %v481_v5  ;;  %v509_v35 = vld [vmem:[%s685_s3 + $0x1] ss:$0 sm:$0xff]  ;;  %v335_v42 = vld [vmem:[#allocation2] sm:$0x1]  ;;  %v510_v45 = vld [vmem:[%s685_s3 + $0x2] ss:$0 sm:$0xff] }
  0x1b   :  { %233 = vmatpush.bf16.msra.mxu1 %v489_v6  ;;  %338 = vperm.xlu0 %507, %v335_v42   ;;  %v333_v54 = vld [vmem:[%s686_s4] sm:$0x1] }
  0x1c   :  { %316 = vmatpush.bf16.msra.mxu2 %v498_v19 }
  0x1e   :  { %151 = vmatpush.bf16.msra.mxu0 %v480_v7 }
  0x1f   :  { %234 = vmatpush.bf16.msra.mxu1 %v488_v8 }
  0x20   :  { %317 = vmatpush.bf16.msra.mxu2 %v497_v20 }
  0x22   :  { %152 = vmatpush.bf16.msra.mxu0 %v479_v9 }
  0x23   :  { %235 = vmatpush.bf16.msra.mxu1 %v487_v14 }
  0x24   :  { %318 = vmatpush.bf16.msra.mxu2 %v496_v21 }
  0x26   :  { %153 = vmatpush.bf16.msra.mxu0 %v478_v10 }
  0x27   :  { %236 = vmatpush.bf16.msra.mxu1 %v486_v15 }
  0x28   :  { %319 = vmatpush.bf16.msra.mxu2 %v495_v30 }
  0x2a   :  { %154 = vmatpush.bf16.msra.mxu0 %v477_v11 }
  0x2b   :  { %237 = vmatpush.bf16.msra.mxu1 %v485_v16 }
  0x2c   :  { %320 = vmatpush.bf16.msra.mxu2 %v494_v31 }
  0x2e   :  { %155 = vmatpush.bf16.msra.mxu0 %v476_v12 }
  0x2f   :  { %238 = vmatpush.bf16.msra.mxu1 %v484_v17 }
  0x30   :  { %321 = vmatpush.bf16.msra.mxu2 %v493_v32 }
  0x31   :  { %156 = vmatmul.bf16.vlgmr.msra.gmra.mxu0 %v475_v13 }
  0x34   :  { %322 = vmatpush.bf16.msra.mxu2 %v492_v33 }
  0x8d   :  { %v339_v55 = vpop.permute.xlu0 %338 }
  0x8e   :  { %v341_v56 = vperm.slane %v339_v55, 0 }
  0xae   :  { %v157_v22 = vpop.f32.mrf.mxu0 }
  0xaf   :  { %v158_v24 = vadd.f32 %v508_v23, %v157_v22 }
  0xb1   :  { %v162_v27 = vmax.f32 %v158_v24, 0.0 }
  0xb6   :  { %v159_v25 = vpop.f32.mrf.mxu0 }
  0xb7   :  { %v160_v26 = vadd.f32 %v508_v23, %v159_v25 }
  0xb9   :  { %v163_v28 = vmax.f32 %v160_v26, 0.0 }
  0xbb   :  { %v164_v29 = vpack.c.bf16 %v163_v28, %v162_v27 }
  0xbd   :  { %239 = vmatmul.bf16.vlgmr.msra.gmra.mxu1 %v164_v29 }
 0x13a   :  { %v240_v34 = vpop.f32.mrf.mxu1 }
 0x13b   :  { %v241_v36 = vadd.f32 %v509_v35, %v240_v34 }
 0x13d   :  { %v245_v39 = vmax.f32 %v241_v36, 0.0 }
 0x142   :  { %v242_v37 = vpop.f32.mrf.mxu1 }
 0x143   :  { %v243_v38 = vadd.f32 %v509_v35, %v242_v37 }
 0x145   :  { %v246_v40 = vmax.f32 %v243_v38, 0.0 }
 0x147   :  { %v247_v41 = vpack.c.bf16 %v246_v40, %v245_v39 }
 0x149   :  { %323 = vmatmul.bf16.vlgmr.msra.gmra.mxu2 %v247_v41 }
 0x1cc   :  { %v324_v44 = vpop.f32.mrf.mxu2 }
 0x1cd   :  { %v325_v46 = vadd.f32 %v510_v45, %v324_v44 }
 0x1cf   :  { %v329_v49 = vadd.f32 %v325_v46, %v162_v27 }
 0x1d1   :  { %v331_v51 = vmax.f32 %v329_v49, 0.0 }
 0x1d4   :  { %v326_v47 = vpop.f32.mrf.mxu2 }
 0x1d5   :  { %v327_v48 = vadd.f32 %v510_v45, %v326_v47 }
 0x1d7   :  { %v330_v50 = vadd.f32 %v327_v48, %v163_v28 }
 0x1d9   :  { %v332_v52 = vmax.f32 %v330_v50, 0.0 }
 0x1db   :  { %v334_v53 = vpack.c.bf16 %v332_v52, %v331_v51 }
 0x1dd   :  { %349 = vmatpush.bf16.xpose.msra.mxu3 %v334_v53 }
 0x1e4   :  { %350 = vmatmul.bf16.vlgmr.msra.gmra.mxu3 %v333_v54 }
 0x267   :  { %v351_v57 = vpop.f32.mrf.mxu3 }
 0x268   :  { %v352_v58 = vadd.f32 %v351_v57, %v341_v56 }
 0x26a   :  { %356 = vst.msk [vmem:[#allocation9] sm:$0x1] %vm355_vm0, %v352_v58 }
 0x26b   :  { %367 = dma.vmem_to_hbm [thread:$0]  %s363_s21, 16, %s365_s23, [#allocation5]  }
 0x26f   :  { %v353_v59 = vpop.f32.mrf.mxu3 }
 0x270   :  { %611 = dma.done.wait [#allocation5], 16  }
 0x271   :  { %612 = vsyncadd [#allocation5], 4294967280 }
 0x272   :  { %372 = vsyncpa [#allocation4], 1 }
 0x273   :  { %373 = vsyncpa [#allocation7], 1 }
 0x274   :  { %374 = vsyncpa [#allocation5], 1 }

// kernel: tpu_custom_call.1
= control target key start
LH: loop header
LB: loop body
LE: loop exit
PB: predicated region body
PF: predicated region fallthrough
CT: control target
= control target key end

     0   :  { %s682_s0 = inlined_call_operand.hbm [shape: bf16[16,128], index: 0, kind: input, shape index: {}]   ;;  %s683_s1 = inlined_call_operand.hbm [shape: bf16[128,128], index: 1, kind: input, shape index: {}]   ;;  %s684_s2 = inlined_call_operand.hbm [shape: bf16[2,128,128], index: 2, kind: input, shape index: {}]   ;;  %s685_s3 = inlined_call_operand.vmem [shape: f32[3,128], index: 3, kind: input, shape index: {}]   ;;  %s686_s4 = inlined_call_operand.vmem [shape: bf16[1,128], index: 4, kind: input, shape index: {}]   ;;  %s687_s5 = inlined_call_operand.<no memory space> [shape: f32[1,1], index: 5, kind: input, shape index: {}]   ;;  %s688_s6 = inlined_call_operand.hbm [shape: f32[1,16], index: 6, kind: output, shape index: {}]  }
   0x1   :  { %v11_v0 = vstv %s687_s5 }
   0x2   :  { %12 = vst [vmem:[#allocation2] sm:$0x1] %v11_v0 }
   0x3   :  { %13 = vsyncpa [#allocation4], 0 }
   0x4   :  { %14 = vsyncpa [#allocation7], 0 }
   0x5   :  { %15 = vsyncpa [#allocation5], 0  ;;  %s33_s25 = sshll.u32 %s683_s1, 4  ;;  %s613_s26 = smov [#allocation6]   ;;  %s34_s25 = int_to_ptr.hbm [resolvable:$true] %s33_s25 }
   0x6   :  { %s35_s27 = sshll.u32 %s613_s26, 4  ;;  %s20_s30 = sshll.u32 %s682_s0, 4  ;;  %s36_s27 = int_to_ptr.vmem [resolvable:$true] %s35_s27  ;;  %s21_s30 = int_to_ptr.hbm [resolvable:$true] %s20_s30 }
   0x7   :  { %s614_s7 = smov 64   ;;  %s615_s8 = smov 4  }
   0x8   :  { %41 = dma.hbm_to_vmem [thread:$0]  %s34_s25, 1024, %s36_s27, [#allocation7], %s614_s7, %s614_s7, %s615_s8  }
   0x9   :  { %s616_s5 = smov [#allocation3]   ;;  %s46_s12 = sshll.u32 %s684_s2, 4  ;;  %s47_s12 = int_to_ptr.hbm [resolvable:$true] %s46_s12 }
   0xa   :  { %s22_s9 = sshll.u32 %s616_s5, 4  ;;  %s617_s1 = smov [#allocation8]   ;;  %s23_s9 = int_to_ptr.vmem [resolvable:$true] %s22_s9 }
   0xb   :  { %28 = dma.hbm_to_vmem [thread:$0]  %s21_s30, 128, %s23_s9, [#allocation4], %s614_s7, %s614_s7, %s615_s8  }
   0xc   :  { %s48_s13 = sshll.u32 %s617_s1, 4  ;;  %s49_s13 = int_to_ptr.vmem [resolvable:$true] %s48_s13 }
   0xd   :  { %54 = dma.hbm_to_vmem [thread:$0]  %s47_s12, 2048, %s49_s13, [#allocation7], %s614_s7, %s614_s7, %s615_s8  }
   0xe   :  { %607 = dma.done.wait [#allocation4], 128  }
   0xf   :  { %608 = vsyncadd [#allocation4], 4294967168 }
  0x10   :  { %609 = dma.done.wait [#allocation7], 3072  }
  0x11   :  { %610 = vsyncadd [#allocation7], 4294964224  ;;  %v483_v1 = vld [vmem:[#allocation6 + $0x38] sm:$0xff]  ;;  %v482_v2 = vld [vmem:[#allocation6 + $0x30] sm:$0xff]  ;;  %v618_v43 = vmov 0   ;;  %s619_s20 = smov [#allocation9]  }
  0x12   :  { %148 = vmatpush.bf16.msra.mxu0 %v483_v1  ;;  %v491_v3 = vld [vmem:[#allocation8 + $0x38] sm:$0xff]  ;;  %v490_v4 = vld [vmem:[#allocation8 + $0x30] sm:$0xff]  ;;  %v481_v5 = vld [vmem:[#allocation6 + $0x28] sm:$0xff]  ;;  %507 = vset.pattern.permute.xlu0 %v618_v43  ;;  %s362_s21 = sshll.u32 %s619_s20, 4  ;;  %s364_s23 = sshll.u32 %s688_s6, 4  ;;  %vm355_vm0 = vcmask 122880   ;;  %s363_s21 = int_to_ptr.vmem [resolvable:$true] %s362_s21  ;;  %s365_s23 = int_to_ptr.hbm [resolvable:$true] %s364_s23 }
  0x13   :  { %231 = vmatpush.bf16.msra.mxu1 %v491_v3  ;;  %v489_v6 = vld [vmem:[#allocation8 + $0x28] sm:$0xff]  ;;  %v480_v7 = vld [vmem:[#allocation6 + $0x20] sm:$0xff]  ;;  %v479_v9 = vld [vmem:[#allocation6 + $0x18] sm:$0xff] }
  0x14   :  { %v488_v8 = vld [vmem:[#allocation8 + $0x20] sm:$0xff]  ;;  %v478_v10 = vld [vmem:[#allocation6 + $0x10] sm:$0xff]  ;;  %v477_v11 = vld [vmem:[#allocation6 + $0x8] sm:$0xff] }
  0x15   :  { %v476_v12 = vld [vmem:[#allocation6] sm:$0xff]  ;;  %v475_v13 = vld [vmem:[#allocation3] sm:$0xff]  ;;  %v486_v15 = vld [vmem:[#allocation8 + $0x10] sm:$0xff] }
  0x16   :  { %149 = vmatpush.bf16.msra.mxu0 %v482_v2  ;;  %v487_v14 = vld [vmem:[#allocation8 + $0x18] sm:$0xff]  ;;  %v485_v16 = vld [vmem:[#allocation8 + $0x8] sm:$0xff]  ;;  %v484_v17 = vld [vmem:[#allocation8] sm:$0xff] }
  0x17   :  { %232 = vmatpush.bf16.msra.mxu1 %v490_v4  ;;  %v499_v18 = vld [vmem:[#allocation8 + $0x78] sm:$0xff]  ;;  %v498_v19 = vld [vmem:[#allocation8 + $0x70] sm:$0xff]  ;;  %v497_v20 = vld [vmem:[#allocation8 + $0x68] sm:$0xff] }
  0x18   :  { %315 = vmatpush.bf16.msra.mxu2 %v499_v18  ;;  %v496_v21 = vld [vmem:[#allocation8 + $0x60] sm:$0xff]  ;;  %v508_v23 = vld [vmem:[%s685_s3] ss:$0 sm:$0xff]  ;;  %v495_v30 = vld [vmem:[#allocation8 + $0x58] sm:$0xff] }
  0x19   :  { %v494_v31 = vld [vmem:[#allocation8 + $0x50] sm:$0xff]  ;;  %v493_v32 = vld [vmem:[#allocation8 + $0x48] sm:$0xff]  ;;  %v492_v33 = vld [vmem:[#allocation8 + $0x40] sm:$0xff] }
  0x1a   :  { %150 = vmatpush.bf16.msra.mxu0 %v481_v5  ;;  %v509_v35 = vld [vmem:[%s685_s3 + $0x1] ss:$0 sm:$0xff]  ;;  %v335_v42 = vld [vmem:[#allocation2] sm:$0x1]  ;;  %v510_v45 = vld [vmem:[%s685_s3 + $0x2] ss:$0 sm:$0xff] }
  0x1b   :  { %233 = vmatpush.bf16.msra.mxu1 %v489_v6  ;;  %338 = vperm.xlu0 %507, %v335_v42   ;;  %v333_v54 = vld [vmem:[%s686_s4] sm:$0x1] }
  0x1c   :  { %316 = vmatpush.bf16.msra.mxu2 %v498_v19 }
  0x1e   :  { %151 = vmatpush.bf16.msra.mxu0 %v480_v7 }
  0x1f   :  { %234 = vmatpush.bf16.msra.mxu1 %v488_v8 }
  0x20   :  { %317 = vmatpush.bf16.msra.mxu2 %v497_v20 }
  0x22   :  { %152 = vmatpush.bf16.msra.mxu0 %v479_v9 }
  0x23   :  { %235 = vmatpush.bf16.msra.mxu1 %v487_v14 }
  0x24   :  { %318 = vmatpush.bf16.msra.mxu2 %v496_v21 }
  0x26   :  { %153 = vmatpush.bf16.msra.mxu0 %v478_v10 }
  0x27   :  { %236 = vmatpush.bf16.msra.mxu1 %v486_v15 }
  0x28   :  { %319 = vmatpush.bf16.msra.mxu2 %v495_v30 }
  0x2a   :  { %154 = vmatpush.bf16.msra.mxu0 %v477_v11 }
  0x2b   :  { %237 = vmatpush.bf16.msra.mxu1 %v485_v16 }
  0x2c   :  { %320 = vmatpush.bf16.msra.mxu2 %v494_v31 }
  0x2e   :  { %155 = vmatpush.bf16.msra.mxu0 %v476_v12 }
  0x2f   :  { %238 = vmatpush.bf16.msra.mxu1 %v484_v17 }
  0x30   :  { %321 = vmatpush.bf16.msra.mxu2 %v493_v32 }
  0x31   :  { %156 = vmatmul.bf16.vlgmr.msra.gmra.mxu0 %v475_v13 }
  0x34   :  { %322 = vmatpush.bf16.msra.mxu2 %v492_v33 }
  0x8d   :  { %v339_v55 = vpop.permute.xlu0 %338 }
  0x8e   :  { %v341_v56 = vperm.slane %v339_v55, 0 }
  0xae   :  { %v157_v22 = vpop.f32.mrf.mxu0 }
  0xaf   :  { %v158_v24 = vadd.f32 %v508_v23, %v157_v22 }
  0xb1   :  { %v162_v27 = vmax.f32 %v158_v24, 0.0 }
  0xb6   :  { %v159_v25 = vpop.f32.mrf.mxu0 }
  0xb7   :  { %v160_v26 = vadd.f32 %v508_v23, %v159_v25 }
  0xb9   :  { %v163_v28 = vmax.f32 %v160_v26, 0.0 }
  0xbb   :  { %v164_v29 = vpack.c.bf16 %v163_v28, %v162_v27 }
  0xbd   :  { %239 = vmatmul.bf16.vlgmr.msra.gmra.mxu1 %v164_v29 }
 0x13a   :  { %v240_v34 = vpop.f32.mrf.mxu1 }
 0x13b   :  { %v241_v36 = vadd.f32 %v509_v35, %v240_v34 }
 0x13d   :  { %v245_v39 = vmax.f32 %v241_v36, 0.0 }
 0x142   :  { %v242_v37 = vpop.f32.mrf.mxu1 }
 0x143   :  { %v243_v38 = vadd.f32 %v509_v35, %v242_v37 }
 0x145   :  { %v246_v40 = vmax.f32 %v243_v38, 0.0 }
 0x147   :  { %v247_v41 = vpack.c.bf16 %v246_v40, %v245_v39 }
 0x149   :  { %323 = vmatmul.bf16.vlgmr.msra.gmra.mxu2 %v247_v41 }
 0x1cc   :  { %v324_v44 = vpop.f32.mrf.mxu2 }
 0x1cd   :  { %v325_v46 = vadd.f32 %v510_v45, %v324_v44 }
 0x1cf   :  { %v329_v49 = vadd.f32 %v325_v46, %v162_v27 }
 0x1d1   :  { %v331_v51 = vmax.f32 %v329_v49, 0.0 }
 0x1d4   :  { %v326_v47 = vpop.f32.mrf.mxu2 }
 0x1d5   :  { %v327_v48 = vadd.f32 %v510_v45, %v326_v47 }
 0x1d7   :  { %v330_v50 = vadd.f32 %v327_v48, %v163_v28 }
 0x1d9   :  { %v332_v52 = vmax.f32 %v330_v50, 0.0 }
 0x1db   :  { %v334_v53 = vpack.c.bf16 %v332_v52, %v331_v51 }
 0x1dd   :  { %349 = vmatpush.bf16.xpose.msra.mxu3 %v334_v53 }
 0x1e4   :  { %350 = vmatmul.bf16.vlgmr.msra.gmra.mxu3 %v333_v54 }
 0x267   :  { %v351_v57 = vpop.f32.mrf.mxu3 }
 0x268   :  { %v352_v58 = vadd.f32 %v351_v57, %v341_v56 }
 0x26a   :  { %356 = vst.msk [vmem:[#allocation9] sm:$0x1] %vm355_vm0, %v352_v58 }
 0x26b   :  { %367 = dma.vmem_to_hbm [thread:$0]  %s363_s21, 16, %s365_s23, [#allocation5]  }
 0x26f   :  { %v353_v59 = vpop.f32.mrf.mxu3 }
 0x270   :  { %611 = dma.done.wait [#allocation5], 16  }
 0x271   :  { %612 = vsyncadd [#allocation5], 4294967280 }
 0x272   :  { %372 = vsyncpa [#allocation4], 1 }
 0x273   :  { %373 = vsyncpa [#allocation7], 1 }
 0x274   :  { %374 = vsyncpa [#allocation5], 1 }

</bundles_post_ra>
